<compile_context>
chip_gen: v7x
topology: tpu7x:2x2x1
jax: 0.10.0
libtpu: 0.0.40
codegen_flags: <defaults>
</compile_context>

<pallas_src>
import math

import jax
import jax.numpy as jnp
from jax.experimental import pallas as pl
from jax.experimental.pallas import tpu as pltpu

_LANE = 128
_SQRT_HALF = 1.0 / math.sqrt(2.0)


def _round_up(x: int, m: int) -> int:
    return (x + m - 1) // m * m


def _sublane(dtype) -> int:
    # Minimum row multiple for packed layouts: f32 -> 8, bf16 -> 16, int8 -> 32.
    return {4: 8, 2: 16, 1: 32}.get(jnp.dtype(dtype).itemsize, 8)


def _vmem_budget_bytes() -> int:
    cap = 64 * 1024 * 1024  # conservative fallback: v7x physical VMEM per TC
    try:
        info = pltpu.get_tpu_info()
        cap = int(getattr(info, "vmem_capacity_bytes", cap) or cap)
    except Exception:
        pass
    return int(cap * 0.8)  # leave headroom for compiler scratch / semaphores


def _pick_row_block(M: int, sub: int, block_m: int) -> int:
    """Largest row-block (from a halving chain) with <= ~12.5% padded rows."""
    block_m = max(sub, block_m // sub * sub)
    cands, c = [], block_m
    while c > sub:
        cands.append(c)
        c = max(sub, (c // 2) // sub * sub)
    cands.append(sub)
    allow = max(M // 8, sub)
    for c in cands:
        if _round_up(M, c) - M <= allow:
            return c
    return sub


def _pick_dh_chunk(dh_p: int, block_dh: int) -> int:
    """Largest lane-aligned chunk <= block_dh that divides dh_p exactly."""
    block_dh = max(_LANE, block_dh // _LANE * _LANE)
    if dh_p <= block_dh:
        return dh_p
    c = block_dh
    while c > _LANE:
        if dh_p % c == 0:
            return c
        c = max(_LANE, (c // 2) // _LANE * _LANE)
    return _LANE


def _shrink_to_fit(tm, t_dh, din_p, dh_p, dout_p, mm_size, out_size, sub, budget):
    """Shrink (tm, t_dh) until the double-buffered block footprint fits VMEM."""
    def footprint(tm_, t_dh_):
        stream = 2 * (tm_ * din_p * mm_size        # x block (double-buffered)
                      + din_p * t_dh_ * mm_size    # W1 chunk
                      + t_dh_ * 4                  # b1 chunk
                      + t_dh_ * dout_p * mm_size   # W2 chunk
                      + dout_p * 4                 # b2
                      + tm_ * dout_p * out_size)   # out block
        scratch = tm_ * dout_p * 4                 # f32 accumulator
        interm = 2 * tm_ * t_dh_ * 4               # GELU intermediate (+slack)
        return stream + scratch + interm

    while footprint(tm, t_dh) > budget and (tm > sub or t_dh > _LANE):
        if t_dh >= tm and t_dh > _LANE:
            t_dh = _pick_dh_chunk(dh_p, t_dh // 2)
        elif tm > sub:
            tm = max(sub, tm // 2 // sub * sub)
        else:
            t_dh = _pick_dh_chunk(dh_p, t_dh // 2)
    return tm, t_dh


def _mlp_kernel(x_ref, w1_ref, b1_ref, w2_ref, b2_ref, o_ref, acc_ref):
    # x_ref : (tm, Din_p)       row-block of tokens (constant across k)
    # w1_ref: (Din_p, t_dh)     fc1 weight chunk (in x hidden-chunk)
    # b1_ref: (1, t_dh)
    # w2_ref: (t_dh, Dout_p)    fc2 weight chunk (hidden-chunk x out)
    # b2_ref: (1, Dout_p)
    # o_ref : (tm, Dout_p)
    # acc_ref: (tm, Dout_p) f32 scratch accumulator
    k = pl.program_id(1)

    @pl.when(k == 0)
    def _():
        acc_ref[...] = jnp.zeros_like(acc_ref)

    # fc1 on this hidden chunk (f32 accumulation on the MXU).
    h = jnp.dot(x_ref[...], w1_ref[...], preferred_element_type=jnp.float32)
    h = h + b1_ref[...]
    # Exact (erf) GELU in f32, matching nn.GELU default approximate='none'.
    h = h * 0.5 * (1.0 + jax.lax.erf(h * _SQRT_HALF))
    # fc2 partial product, accumulated over hidden chunks.
    acc_ref[...] += jnp.dot(h.astype(w2_ref.dtype), w2_ref[...],
                            preferred_element_type=jnp.float32)

    @pl.when(k == pl.num_programs(1) - 1)
    def _():
        o_ref[...] = (acc_ref[...] + b2_ref[...]).astype(o_ref.dtype)


def prepare_mlp_params(fc1_w, fc1_b, fc2_w, fc2_b, *, matmul_dtype=None):
    """One-time parameter prep (do NOT repeat per forward): transpose PyTorch
    Linear weights to (in, out), zero-pad feature dims to multiples of 128
    (mathematically exact for Linear/GELU) and cast MXU operands."""
    dh, din = fc1_w.shape
    dout = fc2_w.shape[0]
    din_p, dh_p, dout_p = (_round_up(d, _LANE) for d in (din, dh, dout))
    mm_dtype = jnp.dtype(matmul_dtype) if matmul_dtype is not None \
        else jnp.dtype(fc1_w.dtype)

    w1 = jnp.pad(fc1_w.T, ((0, din_p - din), (0, dh_p - dh))).astype(mm_dtype)
    w2 = jnp.pad(fc2_w.T, ((0, dh_p - dh), (0, dout_p - dout))).astype(mm_dtype)
    # Biases stay f32: tiny, and all element-wise math is done in f32.
    b1 = jnp.pad(fc1_b, (0, dh_p - dh)).reshape(1, dh_p).astype(jnp.float32)
    b2 = jnp.pad(fc2_b, (0, dout_p - dout)).reshape(1, dout_p).astype(jnp.float32)
    return dict(w1=w1, b1=b1, w2=w2, b2=b2,
                din=din, dh=dh, dout=dout, matmul_dtype=mm_dtype)


def mlp_forward(x, params, *, block_m=512, block_dh=512, vmem_budget=None):
    """Fused Mlp forward.  x: (..., in_features) -> (..., out_features)."""
    din, dh, dout = params["din"], params["dh"], params["dout"]
    assert x.shape[-1] == din, (x.shape, din)
    w1, b1, w2, b2 = params["w1"], params["b1"], params["w2"], params["b2"]
    din_p, dh_p = w1.shape
    dout_p = w2.shape[1]
    mm_dtype = params["matmul_dtype"]
    out_dtype = x.dtype

    lead = x.shape[:-1]
    M = int(math.prod(lead)) if lead else 1

    sub = _sublane(mm_dtype)
    tm = _pick_row_block(M, sub, block_m)
    t_dh = _pick_dh_chunk(dh_p, block_dh)

    budget = int(vmem_budget) if vmem_budget is not None else _vmem_budget_bytes()
    tm, t_dh = _shrink_to_fit(tm, t_dh, din_p, dh_p, dout_p,
                              jnp.dtype(mm_dtype).itemsize,
                              jnp.dtype(out_dtype).itemsize,
                              sub, int(budget * 0.85))

    # Keep >=2 row blocks when M allows so megacore chips (2 TCs) can shard
    # the "parallel" M axis.
    while _round_up(M, tm) // tm < 2 and tm > sub:
        tm = max(sub, tm // 2 // sub * sub)

    M_p = _round_up(M, tm)
    num_m, num_k = M_p // tm, dh_p // t_dh

    x_p = jnp.pad(x.reshape(M, din).astype(mm_dtype),
                  ((0, M_p - M), (0, din_p - din)))

    flops = 2 * M_p * din_p * dh_p + 2 * M_p * dh_p * dout_p
    bytes_accessed = int(
        x_p.size * x_p.dtype.itemsize
        + w1.size * w1.dtype.itemsize + w2.size * w2.dtype.itemsize
        + b1.size * 4 + b2.size * 4
        + M_p * dout_p * jnp.dtype(out_dtype).itemsize)

    out_p = pl.pallas_call(
        _mlp_kernel,
        out_shape=jax.ShapeDtypeStruct((M_p, dout_p), out_dtype),
        grid_spec=pltpu.PrefetchScalarGridSpec(
            num_scalar_prefetch=0,
            grid=(num_m, num_k),                 # reduction (Dh) axis last
            in_specs=[
                pl.BlockSpec((tm, din_p), lambda i, k: (i, 0)),    # x
                pl.BlockSpec((din_p, t_dh), lambda i, k: (0, k)),  # W1 chunk
                pl.BlockSpec((1, t_dh), lambda i, k: (0, k)),      # b1 chunk
                pl.BlockSpec((t_dh, dout_p), lambda i, k: (k, 0)), # W2 chunk
                pl.BlockSpec((1, dout_p), lambda i, k: (0, 0)),    # b2
            ],
            out_specs=pl.BlockSpec((tm, dout_p), lambda i, k: (i, 0)),
            scratch_shapes=[pltpu.VMEM((tm, dout_p), jnp.float32)],
        ),
        compiler_params=pltpu.CompilerParams(
            dimension_semantics=("parallel", "arbitrary"),
            vmem_limit_bytes=budget,
        ),
        cost_estimate=pl.CostEstimate(
            flops=flops,
            transcendentals=M_p * dh_p,
            bytes_accessed=bytes_accessed,
        ),
    )(x_p, w1, b1, w2, b2)

    return out_p[:M, :dout].reshape(*lead, dout)


def _reference(x, fc1_w, fc1_b, fc2_w, fc2_b):
    """Pure-JAX f32 reference (matches PyTorch Mlp.forward with drop=0)."""
    h = x @ fc1_w.T + fc1_b
    h = h * 0.5 * (1.0 + jax.lax.erf(h / math.sqrt(2.0)))  # exact GELU
    return h @ fc2_w.T + fc2_b


if __name__ == "__main__":
    key = jax.random.PRNGKey(0)

    def make_params(kk, din, dh, dout):
        k1w, k1b, k2w, k2b = jax.random.split(kk, 4)
        bd1 = 1.0 / math.sqrt(din)
        bd2 = 1.0 / math.sqrt(dh)
        fc1_w = jax.random.uniform(k1w, (dh, din), jnp.float32, -bd1, bd1)
        fc1_b = jax.random.uniform(k1b, (dh,), jnp.float32, -bd1, bd1)
        fc2_w = jax.random.uniform(k2w, (dout, dh), jnp.float32, -bd2, bd2)
        fc2_b = jax.random.uniform(k2b, (dout,), jnp.float32, -bd2, bd2)
        return fc1_w, fc1_b, fc2_w, fc2_b

    kx1, kp1, kx2, kp2 = jax.random.split(key, 4)

    # Case 1: small transformer-token Mlp, f32 MXU path (exact numerics).
    B, S, din, dh, dout = 2, 8, 32, 64, 32
    x = jax.random.normal(kx1, (B, S, din), jnp.float32)
    fc1_w, fc1_b, fc2_w, fc2_b = make_params(kp1, din, dh, dout)
    params = prepare_mlp_params(fc1_w, fc1_b, fc2_w, fc2_b)
    out = jax.block_until_ready(mlp_forward(x, params))
    ref = _reference(x, fc1_w, fc1_b, fc2_w, fc2_b)
    assert out.shape == (B, S, dout), out.shape
    assert jnp.allclose(out, ref, rtol=2e-3, atol=2e-3), (
        float(jnp.max(jnp.abs(out - ref))))

    # Case 2: odd feature dims, multiple row blocks, multiple Dh chunks
    # (exercises the reduction-axis accumulator) and bf16 MXU operands.
    B, S, din, dh, dout = 2, 24, 48, 256, 40
    x = jax.random.normal(kx2, (B, S, din), jnp.float32)
    fc1_w, fc1_b, fc2_w, fc2_b = make_params(kp2, din, dh, dout)
    params_bf16 = prepare_mlp_params(fc1_w, fc1_b, fc2_w, fc2_b,
                                     matmul_dtype=jnp.bfloat16)
    out_bf16 = jax.block_until_ready(
        mlp_forward(x, params_bf16, block_m=16, block_dh=128))
    ref2 = _reference(x, fc1_w, fc1_b, fc2_w, fc2_b)
    assert out_bf16.shape == (B, S, dout), out_bf16.shape
    assert jnp.allclose(out_bf16, ref2, rtol=5e-2, atol=5e-2), (
        float(jnp.max(jnp.abs(out_bf16 - ref2))))

    print("KERNEL_OK")
</pallas_src>

<mosaic_0001>
module attributes {stable_mosaic.version = 11 : i64} {
  func.func @_mlp_kernel(%arg0: i32, %arg1: i32, %arg2: memref<8x128xf32, #tpu.memory_space<vmem>>, %arg3: memref<128x128xf32, #tpu.memory_space<vmem>>, %arg4: memref<1x128xf32, #tpu.memory_space<vmem>>, %arg5: memref<128x128xf32, #tpu.memory_space<vmem>>, %arg6: memref<1x128xf32, #tpu.memory_space<vmem>>, %arg7: memref<8x128xf32, #tpu.memory_space<vmem>>, %arg8: memref<8x128xf32, #tpu.memory_space<vmem>>) attributes {dimension_semantics = [#tpu.dimension_semantics<parallel>, #tpu.dimension_semantics<arbitrary>], iteration_bounds = array<i64: 2, 1>, scalar_prefetch = 0 : i64, scratch_operands = 1 : i64, tpu.core_type = #tpu.core_type<tc>, window_params = [{transform_indices = @transform_0, window_bounds = array<i64: 8, 128>}, {transform_indices = @transform_1, window_bounds = array<i64: 128, 128>}, {transform_indices = @transform_2, window_bounds = array<i64: 1, 128>}, {transform_indices = @transform_3, window_bounds = array<i64: 128, 128>}, {pipeline_mode = #tpu.pipeline_mode<synchronous>, transform_indices = @transform_4, window_bounds = array<i64: 1, 128>}, {transform_indices = @transform_5, window_bounds = array<i64: 8, 128>}]} {
    %c0_i32 = arith.constant 0 : i32
    %0 = arith.cmpi eq, %arg1, %c0_i32 : i32
    %1 = arith.extui %0 : i1 to i32
    %c0_i32_0 = arith.constant 0 : i32
    %2 = arith.cmpi ne, %1, %c0_i32_0 : i32
    scf.if %2 {
      %cst_18 = arith.constant 0.000000e+00 : f32
      %25 = vector.broadcast %cst_18 : f32 to vector<8x128xf32>
      %c0_19 = arith.constant 0 : index
      %c0_20 = arith.constant 0 : index
      %26 = vector.load %arg8[%c0_19, %c0_20] : memref<8x128xf32, #tpu.memory_space<vmem>>, vector<8x128xf32>
      tpu.vector_store %arg8[%c0_19, %c0_20], %25 {strides = array<i32>} : memref<8x128xf32, #tpu.memory_space<vmem>>, vector<8x128xf32>,
    } else {
    }
    %c0 = arith.constant 0 : index
    %c0_1 = arith.constant 0 : index
    %3 = vector.load %arg2[%c0, %c0_1] : memref<8x128xf32, #tpu.memory_space<vmem>>, vector<8x128xf32>
    %c0_2 = arith.constant 0 : index
    %c0_3 = arith.constant 0 : index
    %4 = vector.load %arg3[%c0_2, %c0_3] : memref<128x128xf32, #tpu.memory_space<vmem>>, vector<128x128xf32>
    %cst = arith.constant dense<0.000000e+00> : vector<8x128xf32>
    %5 = tpu.matmul %3, %4, %cst {dimension_numbers = #tpu.dot_dimension_numbers<[1], [0], [0], [1], [0, 0, 1, 1], [], []>} : vector<8x128xf32>, vector<128x128xf32>, vector<8x128xf32> -> vector<8x128xf32>
    %c0_4 = arith.constant 0 : index
    %c0_5 = arith.constant 0 : index
    %6 = vector.load %arg4[%c0_4, %c0_5] : memref<1x128xf32, #tpu.memory_space<vmem>>, vector<1x128xf32>
    %7 = vector.broadcast %6 : vector<1x128xf32> to vector<8x128xf32>
    %8 = arith.addf %5, %7 : vector<8x128xf32>
    %cst_6 = arith.constant 5.000000e-01 : f32
    %9 = vector.broadcast %cst_6 : f32 to vector<8x128xf32>
    %10 = arith.mulf %8, %9 : vector<8x128xf32>
    %cst_7 = arith.constant 0.707106769 : f32
    %11 = vector.broadcast %cst_7 : f32 to vector<8x128xf32>
    %12 = arith.mulf %8, %11 : vector<8x128xf32>
    %13 = math.erf %12 : vector<8x128xf32>
    %cst_8 = arith.constant 1.000000e+00 : f32
    %14 = vector.broadcast %cst_8 : f32 to vector<8x128xf32>
    %15 = arith.addf %14, %13 : vector<8x128xf32>
    %16 = arith.mulf %10, %15 : vector<8x128xf32>
    %c0_9 = arith.constant 0 : index
    %c0_10 = arith.constant 0 : index
    %17 = vector.load %arg8[%c0_9, %c0_10] : memref<8x128xf32, #tpu.memory_space<vmem>>, vector<8x128xf32>
    %c0_11 = arith.constant 0 : index
    %c0_12 = arith.constant 0 : index
    %18 = vector.load %arg5[%c0_11, %c0_12] : memref<128x128xf32, #tpu.memory_space<vmem>>, vector<128x128xf32>
    %cst_13 = arith.constant dense<0.000000e+00> : vector<8x128xf32>
    %19 = tpu.matmul %16, %18, %cst_13 {dimension_numbers = #tpu.dot_dimension_numbers<[1], [0], [0], [1], [0, 0, 1, 1], [], []>} : vector<8x128xf32>, vector<128x128xf32>, vector<8x128xf32> -> vector<8x128xf32>
    %20 = arith.addf %17, %19 : vector<8x128xf32>
    %c0_14 = arith.constant 0 : index
    %c0_15 = arith.constant 0 : index
    %21 = vector.load %arg8[%c0_14, %c0_15] : memref<8x128xf32, #tpu.memory_space<vmem>>, vector<8x128xf32>
    tpu.vector_store %arg8[%c0_14, %c0_15], %20 {strides = array<i32>} : memref<8x128xf32, #tpu.memory_space<vmem>>, vector<8x128xf32>,
    %c0_i32_16 = arith.constant 0 : i32
    %22 = arith.cmpi eq, %arg1, %c0_i32_16 : i32
    %23 = arith.extui %22 : i1 to i32
    %c0_i32_17 = arith.constant 0 : i32
    %24 = arith.cmpi ne, %23, %c0_i32_17 : i32
    scf.if %24 {
      %c0_18 = arith.constant 0 : index
      %c0_19 = arith.constant 0 : index
      %25 = vector.load %arg8[%c0_18, %c0_19] : memref<8x128xf32, #tpu.memory_space<vmem>>, vector<8x128xf32>
      %c0_20 = arith.constant 0 : index
      %c0_21 = arith.constant 0 : index
      %26 = vector.load %arg6[%c0_20, %c0_21] : memref<1x128xf32, #tpu.memory_space<vmem>>, vector<1x128xf32>
      %27 = vector.broadcast %26 : vector<1x128xf32> to vector<8x128xf32>
      %28 = arith.addf %25, %27 : vector<8x128xf32>
      %c0_22 = arith.constant 0 : index
      %c0_23 = arith.constant 0 : index
      %29 = vector.load %arg7[%c0_22, %c0_23] : memref<8x128xf32, #tpu.memory_space<vmem>>, vector<8x128xf32>
      tpu.vector_store %arg7[%c0_22, %c0_23], %28 {strides = array<i32>} : memref<8x128xf32, #tpu.memory_space<vmem>>, vector<8x128xf32>,
    } else {
    }
    return
  }
  func.func @transform_0(%arg0: i32, %arg1: i32) -> (i32, i32) {
    %c0_i32 = arith.constant 0 : i32
    %c0_i32_0 = arith.constant 0 : i32
    return %arg0, %c0_i32 : i32, i32
  }
  func.func @transform_1(%arg0: i32, %arg1: i32) -> (i32, i32) {
    %c0_i32 = arith.constant 0 : i32
    %c0_i32_0 = arith.constant 0 : i32
    return %c0_i32, %arg1 : i32, i32
  }
  func.func @transform_2(%arg0: i32, %arg1: i32) -> (i32, i32) {
    %c0_i32 = arith.constant 0 : i32
    %c0_i32_0 = arith.constant 0 : i32
    return %c0_i32, %arg1 : i32, i32
  }
  func.func @transform_3(%arg0: i32, %arg1: i32) -> (i32, i32) {
    %c0_i32 = arith.constant 0 : i32
    %c0_i32_0 = arith.constant 0 : i32
    return %arg1, %c0_i32 : i32, i32
  }
  func.func @transform_4(%arg0: i32, %arg1: i32) -> (i32, i32) {
    %c0_i32 = arith.constant 0 : i32
    %c0_i32_0 = arith.constant 0 : i32
    %c0_i32_1 = arith.constant 0 : i32
    return %c0_i32, %c0_i32_0 : i32, i32
  }
  func.func @transform_5(%arg0: i32, %arg1: i32) -> (i32, i32) {
    %c0_i32 = arith.constant 0 : i32
    %c0_i32_0 = arith.constant 0 : i32
    return %arg0, %c0_i32 : i32, i32
  }
}

</mosaic_0001>

<bundles_post_ra>
// kernel: tpu_custom_call.1
= control target key start
LH: loop header
LB: loop body
LE: loop exit
PB: predicated region body
PF: predicated region fallthrough
CT: control target
= control target key end

     0   :  { %10 = vsyncpa [#allocation4], 0  ;;  %s1398_s0 = inlined_call_operand.hbm [shape: f32[16,128], index: 0, kind: input, shape index: {}]   ;;  %s1399_s1 = inlined_call_operand.hbm [shape: f32[128,128], index: 1, kind: input, shape index: {}]   ;;  %s1400_s2 = inlined_call_operand.vmem [shape: f32[1,128], index: 2, kind: input, shape index: {}]   ;;  %s1401_s3 = inlined_call_operand.hbm [shape: f32[128,128], index: 3, kind: input, shape index: {}]   ;;  %s1402_s4 = inlined_call_operand.vmem [shape: f32[1,128], index: 4, kind: input, shape index: {}]   ;;  %s1403_s5 = inlined_call_operand.hbm [shape: f32[16,128], index: 5, kind: output, shape index: {}]  }
   0x1   :  { %12 = vsyncpa [#allocation4 + $0x1], 0 }
   0x2   :  { %13 = vsyncpa [#allocation7], 0 }
   0x3   :  { %14 = vsyncpa [#allocation5], 0 }
   0x4   :  { %16 = vsyncpa [#allocation5 + $0x1], 0  ;;  %s1119_s18 = smov 0   ;;  %s1121_s19 = smov 0  }
   0x5   :  { %s1123_s20 = smov 0   ;;  %s1125_s21 = smov 0  }
   0x6   :  { %s1127_s22 = smov 0   ;;  %s1129_s23 = smov 0  }
   0x7 LB: > { %s644_s24 = sadd.s32 4294967295, %s1078_s23   ;;  %s645_s25 = sadd.s32 4294967294, %s1078_s23   ;;  %s1078_s23 = sphi %s1129_s23, %s22_s23   ;;  %s1074_s22 = sphi %s1127_s22, %s1425_s22   ;;  %s1070_s21 = sphi %s1125_s21, %s1424_s21   ;;  %s1066_s20 = sphi %s1123_s20, %s1423_s20   ;;  %s1062_s19 = sphi %s1121_s19, %s1422_s19   ;;  %s1058_s18 = sphi %s1119_s18, %s1421_s18  }
   0x8   : > { %p54_p0 = scmp.ne.s32.totalorder %s1062_s19, %s1058_s18  ;;  %p1153_p1 = scmp.eq.s32.totalorder %s644_s24, 0 }
   0x9   : > { %p1157_p2 = scmp.eq.s32.totalorder %s644_s24, 1  ;;  %p183_p3 = scmp.eq.s32.totalorder %s645_s25, 1 }
   0xa   : > { %s1408_s26 = scalar_select %p1153_p1, 1, 0 }
   0xb   : > { %p1163_p4 = por %p1153_p1, %p54_p0  ;;  %p646_p5 = scmp.ge.s32.totalorder %s1078_s23, 1 }
   0xc   : > { %p1168_p6 = por %p183_p3, %p54_p0  ;;  %p190_p7 = scmp.lt.s32.totalorder %s1078_s23, 3 }
   0xd   : > { %s1410_s28 = scalar_select %p1163_p4, 1, 0 }
   0xe   : > { %s1411_s29 = scalar_select %p1168_p6, 1, 0 }
   0xf   : > { %p1173_p8 = pnand %p646_p5, %p190_p7  ;;  %s1080_s6 = smov [#allocation6]  }
  0x10   : > { %s204_s7 = sshll.u32 %s1080_s6, 4  ;;  %s1081_s9 = smov [#allocation8]   ;;  %s1177_s7 = int_to_ptr.vmem [resolvable:$true] %s204_s7 }
  0x11   : > { %p828_p9 = pneg %p1173_p8  ;;  %s226_s10 = sshll.u32 %s1081_s9, 4  ;;  %s1188_s10 = int_to_ptr.vmem [resolvable:$true] %s226_s10 }
  0x12   : > { %s906_s13 = scalar_lea.hbm %s1399_s1, 2048 }
  0x13   : > { %p1184_p11 = pnand %p828_p9, %p1153_p1  ;;  %p907_p12 = scmp.ne.s32.totalorder %s1399_s1, %s906_s13 }
  0x14   : > { %p913_p5 = scmp.lt.u32.totalorder %s906_s13, %s1399_s1 }
  0x15   : > { %p908_p13 = pneg %p1184_p11 }
  0x17   : > { %p909_p0 = pnand %p908_p13, %p907_p12 }
  0x19   : > { %p910_p3 = pneg %p909_p0 }
  0x1b   : > { %p915_p7 = pnand %p913_p5, %p910_p3 }
  0x1d   : > { %918 = shalt.err (!%p915_p7)
}
  0x1e   : > { %s919_s24 = scalar_lea.vmem %s1177_s7, 2048  ;;  %p927_p1 = scmp.lt.s32.totalorder %s1177_s7, %s1177_s7 }
  0x1f   : > { %p920_p9 = scmp.ne.s32.totalorder %s1177_s7, %s919_s24  ;;  %p928_p12 = scmp.lt.s32.totalorder %s919_s24, %s919_s24 }
  0x21   : > { %p922_p10 = pnand %p920_p9, %p908_p13  ;;  %p929_p0 = por %p928_p12, %p927_p1 }
  0x23   : > { %p923_p6 = pneg %p922_p10 }
  0x25   : > { %p930_p4 = pnand %p929_p0, %p923_p6 }
  0x27   : > { %933 = shalt.err (!%p930_p4)
}
  0x28   : > { %s1082_s25 = smov 128   ;;  %s1083_s6 = smov 8  }
  0x29   : > { %831 = dma.hbm_to_vmem [thread:$0]  (!%p1184_p11), %s1399_s1, 2048, %s1177_s7, [#allocation7], %s1082_s25, %s1082_s25, %s1083_s6  }
  0x2a   : > { %s934_s14 = scalar_lea.hbm %s1401_s3, 2048 }
  0x2b   : > { %p935_p1 = scmp.ne.s32.totalorder %s1401_s3, %s934_s14  ;;  %p941_p10 = scmp.lt.u32.totalorder %s934_s14, %s1401_s3 }
  0x2d   : > { %p937_p4 = pnand %p935_p1, %p908_p13 }
  0x2f   : > { %p938_p6 = pneg %p937_p4 }
  0x31   : > { %p943_p3 = pnand %p941_p10, %p938_p6 }
  0x33   : > { %946 = shalt.err (!%p943_p3)
}
  0x34   : > { %s947_s7 = scalar_lea.vmem %s1188_s10, 2048  ;;  %p955_p12 = scmp.lt.s32.totalorder %s1188_s10, %s1188_s10 }
  0x35   : > { %p948_p5 = scmp.ne.s32.totalorder %s1188_s10, %s947_s7  ;;  %p956_p0 = scmp.lt.s32.totalorder %s947_s7, %s947_s7 }
  0x37   : > { %p950_p7 = pnand %p948_p5, %p908_p13  ;;  %p957_p1 = por %p956_p0, %p955_p12 }
  0x39   : > { %p951_p9 = pneg %p950_p7 }
  0x3b   : > { %p958_p4 = pnand %p957_p1, %p951_p9 }
  0x3d   : > { %961 = shalt.err (!%p958_p4)
}
  0x3e   : > { %834 = dma.hbm_to_vmem [thread:$0]  (!%p1184_p11), %s1401_s3, 2048, %s1188_s10, [#allocation7], %s1082_s25, %s1082_s25, %s1083_s6  }
  0x3f   : > { %s34_s12 = sadd.s32 1, %s1074_s22  ;;  %s41_s13 = sadd.s32 1, %s1066_s20 }
  0x40   : > { %p36_p13 = scmp.ge.s32.totalorder %s34_s12, 2  ;;  %p48_p6 = scmp.ne.s32.totalorder %s1066_s20, %s1062_s19 }
  0x41   : > { %p49_p10 = scmp.eq.s32.totalorder %s1078_s23, 0  ;;  %p845_p3 = scmp.lt.s32.totalorder %s1078_s23, 2 }
  0x42   : > { %s1427_s12 = smov (%p36_p13, %s34_s12), 0  ;;  %p1252_p7 = por %p1157_p2, %p48_p6 }
  0x43   : > { %p50_p5 = por %p49_p10, %p48_p6  ;;  %s38_s14 = ssub.s32 %s1074_s22, %s1427_s12 }
  0x44   : > { %s1414_s8 = scalar_select %p1252_p7, 1, 0 }
  0x45   : > { %s243_s15 = sand.u32 1, %s1066_s20   ;;  %p39_p9 = scmp.eq.s32.totalorder %s38_s14, 0 }
  0x46   : > { %s651_s10 = sshll.u32 %s243_s15, 3  ;;  %s652_s25 = sshll.u32 %s1074_s22, 7 }
  0x47   : > { %s1261_s6 = scalar_select %p39_p9, %s1066_s20, %s41_s13  }
  0x48   : > { %s1266_s24 = scalar_lea.hbm %s1398_s0, %s652_s25  ;;  %s247_s27 = scalar_lea.vmem [#allocation3], %s651_s10 }
  0x49   : > { %s254_s7 = sshll.u32 %s247_s27, 4  ;;  %p1270_p2 = pnand %p845_p3, %p50_p5  ;;  %s1274_s7 = int_to_ptr.vmem [resolvable:$true] %s254_s7 }
  0x4a   : > { %s244_s11 = scalar_lea.sflag [#allocation4], %s243_s15  ;;  %s962_s13 = scalar_lea.hbm %s1266_s24, 128 }
  0x4b   : > { %p963_p11 = scmp.ne.s32.totalorder %s1266_s24, %s962_s13  ;;  %p964_p12 = pneg %p1270_p2 }
  0x4c   : > { %s967_s25 = scalar_lea.hbm %s1398_s0, 256  ;;  %p968_p4 = scmp.lt.u32.totalorder %s1266_s24, %s1398_s0 }
  0x4d   : > { %p965_p0 = pnand %p964_p12, %p963_p11  ;;  %p969_p13 = scmp.lt.u32.totalorder %s967_s25, %s962_s13 }
  0x4e   : > { %p971_p10 = scmp.lt.u32.totalorder %s962_s13, %s1266_s24 }
  0x4f   : > { %p966_p1 = pneg %p965_p0  ;;  %p970_p6 = por %p969_p13, %p968_p4 }
  0x51   : > { %p972_p3 = por %p971_p10, %p970_p6 }
  0x53   : > { %p973_p5 = pnand %p972_p3, %p966_p1 }
  0x55   : > { %976 = shalt.err (!%p973_p5)
}
  0x56   : > { %s977_s15 = scalar_lea.vmem %s1274_s7, 128  ;;  %s1084_s27 = smov [#allocation3]  }
  0x57   : > { %p978_p9 = scmp.ne.s32.totalorder %s1274_s7, %s977_s15  ;;  %s982_s14 = sshll.u32 %s1084_s27, 4  ;;  %s983_s14 = int_to_ptr.vmem [resolvable:$false] %s982_s14 }
  0x58   : > { %s984_s10 = scalar_lea.vmem %s983_s14, 256  ;;  %p985_p7 = scmp.lt.s32.totalorder %s1274_s7, %s983_s14 }
  0x59   : > { %p980_p11 = pnand %p978_p9, %p964_p12  ;;  %p986_p4 = scmp.lt.s32.totalorder %s984_s10, %s977_s15 }
  0x5b   : > { %p981_p0 = pneg %p980_p11  ;;  %p987_p13 = por %p986_p4, %p985_p7 }
  0x5d   : > { %p988_p6 = pnand %p987_p13, %p981_p0 }
  0x5f   : > { %991 = shalt.err (!%p988_p6)
}
  0x60   : > { %838 = dma.hbm_to_vmem [thread:$0]  (!%p1270_p2), %s1266_s24, 128, %s1274_s7, %s244_s11  }
  0x61   : > { %263 = sbr.rel (%p1173_p8) target bundleno = 602 (0x25a), region = 40  ;;  %s1304_s13 = sand.u32 (!%p1173_p8), 1, %s1062_s19  }
  0x62   : > { %s654_s25 = sshll.u32 (!%p1173_p8), %s1304_s13, 3  ;;  %s266_s16 = scalar_lea.sflag (!%p1173_p8), [#allocation4], %s1304_s13 }
  0x63   : > { %s1310_s17 = scalar_lea.vmem (!%p1173_p8), [#allocation3], %s654_s25  ;;  %p1416_p7 = scmp.ne.s32.totalorder (!%p1173_p8), %s1410_s28, 0 }
  0x68   : > { %1045 = dma.done.wait (%p1416_p7), %s266_s16, 128  }
  0x69   : > { %1047 = vsyncadd (%p1416_p7), %s266_s16, 4294967168  ;;  %p1417_p2 = scmp.ne.s32.totalorder %s1408_s26, 0 }
  0x6b   : > { %1049 = dma.done.wait (%p1417_p2), [#allocation7], 4096  }
  0x6c   : > { %1051 = vsyncadd (%p1417_p2), [#allocation7], 4294963200  ;;  %v1085_v0 = vmov 0.0|0.0   ;;  %vm1086_vm0 = vmmov 0   ;;  %v1087_v1 = vmov 0.0   ;;  %v317_v2 = vld [vmem:[#allocation6] sm:$0xff] }
  0x6d   : > { %768 = vmatprep.subr.bf16.mxu0 %v1085_v0  ;;  %730 = vmatprep.mubr.msk.f32.mxu0 %vm1086_vm0, %v1087_v1  ;;  %v318_v3 = vld [vmem:[#allocation6 + $0x8] sm:$0xff]  ;;  %v319_v4 = vld [vmem:[#allocation6 + $0x10] sm:$0xff]  ;;  %v320_v6 = vld [vmem:[#allocation6 + $0x18] sm:$0xff]  ;;  %s661_s7 = sshll.u32 %s1070_s21, 7  ;;  %s306_s9 = scalar_lea.vmem [#allocation9], %s654_s25 }
  0x6e   : > { %792 = vmatprep.subr.bf16.mxu1 %v1085_v0  ;;  %765 = vmatprep.mubr.msk.f32.mxu1 %vm1086_vm0, %v1087_v1  ;;  %v769_v5 = vpack.c.bf16 %v318_v3, %v317_v2  ;;  %v772_v7 = vpack.c.bf16 %v320_v6, %v319_v4  ;;  %v321_v8 = vld [vmem:[#allocation6 + $0x20] sm:$0xff]  ;;  %v322_v9 = vld [vmem:[#allocation6 + $0x28] sm:$0xff]  ;;  %v418_v12 = vld [vmem:[#allocation8 + $0x10] sm:$0xff]  ;;  %s531_s11 = sshll.u32 %s306_s9, 4  ;;  %s1349_s14 = scalar_lea.hbm %s1403_s5, %s661_s7  ;;  %s1351_s11 = int_to_ptr.vmem [resolvable:$true] %s531_s11 }
  0x6f   : > { %v416_v10 = vld [vmem:[#allocation8] sm:$0xff]  ;;  %v417_v11 = vld [vmem:[#allocation8 + $0x8] sm:$0xff]  ;;  %v419_v13 = vld [vmem:[#allocation8 + $0x18] sm:$0xff]  ;;  %v775_v14 = vpack.c.bf16 %v322_v9, %v321_v8  ;;  %s518_s10 = scalar_lea.sflag [#allocation5], %s1304_s13  ;;  %s992_s16 = scalar_lea.vmem %s1351_s11, 128 }
  0x70   : > { %770 = vmatpush3.bf16.msra.mxu0 %v769_v5  ;;  %v793_v15 = vpack.c.bf16 %v417_v11, %v416_v10  ;;  %v323_v16 = vld [vmem:[#allocation6 + $0x30] sm:$0xff]  ;;  %v324_v17 = vld [vmem:[#allocation6 + $0x38] sm:$0xff]  ;;  %v796_v18 = vpack.c.bf16 %v419_v13, %v418_v12  ;;  %v420_v19 = vld [vmem:[#allocation8 + $0x20] sm:$0xff]  ;;  %p993_p8 = scmp.ne.s32.totalorder %s1351_s11, %s992_s16  ;;  %p1418_p12 = scmp.ne.s32.totalorder %s1414_s8, 0 }
  0x71   : > { %771 = vmatprep.subr.bf16.mxu0 %v1085_v0  ;;  %v421_v20 = vld [vmem:[#allocation8 + $0x28] sm:$0xff]  ;;  %v778_v21 = vpack.c.bf16 %v324_v17, %v323_v16  ;;  %v325_v22 = vld [vmem:[#allocation6 + $0x40] sm:$0xff]  ;;  %v327_v26 = vld [vmem:[#allocation6 + $0x50] sm:$0xff]  ;;  %s1088_s21 = smov [#allocation9]  }
  0x72   : > { %794 = vmatpush3.bf16.msra.mxu1 %v793_v15  ;;  %v326_v23 = vld [vmem:[#allocation6 + $0x48] sm:$0xff]  ;;  %v799_v24 = vpack.c.bf16 %v421_v20, %v420_v19  ;;  %v328_v27 = vld [vmem:[#allocation6 + $0x58] sm:$0xff]  ;;  %v329_v29 = vld [vmem:[#allocation6 + $0x60] sm:$0xff]  ;;  %p994_p1 = pnand %p993_p8, %p1418_p12  ;;  %s996_s25 = sshll.u32 %s1088_s21, 4  ;;  %s997_s25 = int_to_ptr.vmem [resolvable:$false] %s996_s25 }
  0x73   : > { %795 = vmatprep.subr.bf16.mxu1 %v1085_v0  ;;  %v781_v25 = vpack.c.bf16 %v326_v23, %v325_v22  ;;  %v784_v28 = vpack.c.bf16 %v328_v27, %v327_v26  ;;  %v330_v30 = vld [vmem:[#allocation6 + $0x68] sm:$0xff]  ;;  %v331_v32 = vld [vmem:[#allocation6 + $0x70] sm:$0xff]  ;;  %v332_v33 = vld [vmem:[#allocation6 + $0x78] sm:$0xff]  ;;  %p999_p3 = scmp.lt.s32.totalorder %s1351_s11, %s997_s25 }
  0x74   : > { %773 = vmatpush3.bf16.msra.mxu0 %v772_v7  ;;  %v787_v31 = vpack.c.bf16 %v330_v30, %v329_v29  ;;  %v790_v34 = vpack.c.bf16 %v332_v33, %v331_v32  ;;  %v316_v35 = vld [vmem:[%s1310_s17] sm:$0xff]  ;;  %v424_v39 = vld [vmem:[#allocation8 + $0x40] sm:$0xff]  ;;  %v425_v40 = vld [vmem:[#allocation8 + $0x48] sm:$0xff]  ;;  %p995_p10 = pneg %p994_p1  ;;  %s998_s17 = scalar_lea.vmem %s997_s25, 256 }
  0x75   : > { %774 = vmatprep.subr.bf16.mxu0 %v1085_v0  ;;  %v422_v36 = vld [vmem:[#allocation8 + $0x30] sm:$0xff]  ;;  %v423_v37 = vld [vmem:[#allocation8 + $0x38] sm:$0xff]  ;;  %v805_v41 = vpack.c.bf16 %v425_v40, %v424_v39  ;;  %v428_v45 = vld [vmem:[#allocation8 + $0x60] sm:$0xff]  ;;  %p1000_p5 = scmp.lt.s32.totalorder %s998_s17, %s992_s16 }
  0x76   : > { %797 = vmatpush3.bf16.msra.mxu1 %v796_v18  ;;  %v802_v38 = vpack.c.bf16 %v423_v37, %v422_v36  ;;  %v426_v42 = vld [vmem:[#allocation8 + $0x50] sm:$0xff]  ;;  %v427_v43 = vld [vmem:[#allocation8 + $0x58] sm:$0xff]  ;;  %v429_v46 = vld [vmem:[#allocation8 + $0x68] sm:$0xff] }
  0x77   : > { %798 = vmatprep.subr.bf16.mxu1 %v1085_v0  ;;  %v808_v44 = vpack.c.bf16 %v427_v43, %v426_v42  ;;  %v811_v47 = vpack.c.bf16 %v429_v46, %v428_v45  ;;  %v430_v48 = vld [vmem:[#allocation8 + $0x70] sm:$0xff]  ;;  %v431_v49 = vld [vmem:[#allocation8 + $0x78] sm:$0xff]  ;;  %p1001_p9 = por %p1000_p5, %p999_p3 }
  0x78   : > { %776 = vmatpush3.bf16.msra.mxu0 %v775_v14  ;;  %v814_v50 = vpack.c.bf16 %v431_v49, %v430_v48  ;;  %v658_v51 = vld [vmem:[%s1400_s2] ss:$0 sm:$0xff] }
  0x79   : > { %777 = vmatprep.subr.bf16.mxu0 %v1085_v0  ;;  %v659_v60 = vld [vmem:[%s1402_s4] ss:$0 sm:$0xff]  ;;  %p1002_p11 = pnand %p1001_p9, %p995_p10 }
  0x7a   : > { %800 = vmatpush3.bf16.msra.mxu1 %v799_v24 }
  0x7b   : > { %801 = vmatprep.subr.bf16.mxu1 %v1085_v0 }
  0x7c   : > { %779 = vmatpush3.bf16.msra.mxu0 %v778_v21 }
  0x7d   : > { %780 = vmatprep.subr.bf16.mxu0 %v1085_v0 }
  0x7e   : > { %803 = vmatpush3.bf16.msra.mxu1 %v802_v38 }
  0x7f   : > { %804 = vmatprep.subr.bf16.mxu1 %v1085_v0 }
  0x80   : > { %782 = vmatpush3.bf16.msra.mxu0 %v781_v25 }
  0x81   : > { %783 = vmatprep.subr.bf16.mxu0 %v1085_v0 }
  0x82   : > { %806 = vmatpush3.bf16.msra.mxu1 %v805_v41 }
  0x83   : > { %807 = vmatprep.subr.bf16.mxu1 %v1085_v0 }
  0x84   : > { %785 = vmatpush3.bf16.msra.mxu0 %v784_v28 }
  0x85   : > { %786 = vmatprep.subr.bf16.mxu0 %v1085_v0 }
  0x86   : > { %809 = vmatpush3.bf16.msra.mxu1 %v808_v44 }
  0x87   : > { %810 = vmatprep.subr.bf16.mxu1 %v1085_v0 }
  0x88   : > { %788 = vmatpush3.bf16.msra.mxu0 %v787_v31 }
  0x89   : > { %789 = vmatprep.subr.bf16.mxu0 %v1085_v0 }
  0x8a   : > { %812 = vmatpush3.bf16.msra.mxu1 %v811_v47 }
  0x8b   : > { %813 = vmatprep.subr.bf16.mxu1 %v1085_v0 }
  0x8c   : > { %791 = vmatpush3.bf16.msra.mxu0 %v790_v34 }
  0x8e   : > { %815 = vmatpush3.bf16.msra.mxu1 %v814_v50 }
  0x8f   : > { %731 = vmatmul.mubr.f32.vlgmr.msra.gmra.mrb[0].mxu0 %v316_v35 }
 0x162   : > { %v406_v52 = vpop.f32.mrb[0].mxu0 }
 0x163   : > { %v407_v53 = vadd.f32 %v658_v51, %v406_v52  ;;  %v732_v54 = vpop.f32.mrb[1].mxu0 }
 0x165   : > { %v411_v55 = vmul.f32 0.70710677, %v407_v53  ;;  %v410_v57 = vmul.f32 0.5, %v407_v53 }
 0x167   : > { %904 = verf.f32 %v411_v55 }
 0x171   : > { %v905_v56 = vpop.eup %904 }
 0x172   : > { %v413_v58 = vadd.f32 1.0, %v905_v56 }
 0x174   : > { %v414_v59 = vmul.f32 %v413_v58, %v410_v57 }
 0x176   : > { %766 = vmatmul.mubr.f32.vlgmr.msra.gmra.mrb[0].mxu1 %v414_v59 }
 0x249   : > { %v498_v61 = vpop.f32.mrb[0].mxu1 }
 0x24a   : > { %v515_v62 = vadd.f32 %v659_v60, %v498_v61  ;;  %v767_v63 = vpop.f32.mrb[1].mxu1 }
 0x24c   : > { %516 = vst [vmem:[%s306_s9] sm:$0xff] %v515_v62 }
 0x24d   : > { %1005 = shalt.err (!%p1002_p11)
}
 0x24e   : > { %s1006_s13 = scalar_lea.hbm %s1349_s14, 128  ;;  %s1010_s30 = scalar_lea.hbm %s1403_s5, 256 }
 0x24f   : > { %p1007_p0 = scmp.ne.s32.totalorder %s1349_s14, %s1006_s13  ;;  %p1011_p6 = scmp.lt.u32.totalorder %s1349_s14, %s1403_s5 }
 0x250   : > { %p1012_p7 = scmp.lt.u32.totalorder %s1010_s30, %s1006_s13  ;;  %p1014_p8 = scmp.lt.u32.totalorder %s1006_s13, %s1349_s14 }
 0x251   : > { %p1008_p4 = pnand %p1007_p0, %p1418_p12 }
 0x252   : > { %p1013_p2 = por %p1012_p7, %p1011_p6 }
 0x253   : > { %p1009_p13 = pneg %p1008_p4 }
 0x254   : > { %p1015_p1 = por %p1014_p8, %p1013_p2 }
 0x256   : > { %p1016_p10 = pnand %p1015_p1, %p1009_p13 }
 0x258   : > { %1019 = shalt.err (!%p1016_p10)
}
 0x259   : > { %826 = dma.vmem_to_hbm [thread:$0]  (%p1418_p12), %s1351_s11, 128, %s1349_s14, %s518_s10  }
 0x25a PF: > { %s543_s9 = sand.u32 1, %s1058_s18   ;;  %p1419_p3 = scmp.ne.s32.totalorder %s1411_s29, 0 }
 0x25b   : > { %p1420_p5 = scmp.ge.s32.totalorder %s1078_s23, 2  ;;  %s544_s15 = scalar_lea.sflag [#allocation5], %s543_s9 }
 0x25d   : > { %p840_p9 = pnand %p1420_p5, %p1419_p3 }
 0x25f   : > { %1053 = dma.done.wait (!%p840_p9), %s544_s15, 128  }
 0x260   : > { %1055 = vsyncadd (!%p840_p9), %s544_s15, 4294967168  ;;  %s22_s23 = sadd.s32 1, %s1078_s23   ;;  %s1421_s18 = smov %s1062_s19 }
 0x261   : > { %p19_p11 = scmp.ge.s32.totalorder %s22_s23, 4   ;;  %s1422_s19 = smov %s1066_s20 }
 0x262   : > { %s1423_s20 = smov %s1261_s6  ;;  %s1424_s21 = smov %s1074_s22 }
 0x263   : > { %s1425_s22 = smov %s1427_s12  ;;  %21 = sbr.rel (!%p19_p11) target bundleno = 7 (0x7), region = 106 }
 0x26a   :  { %549 = vsyncpa [#allocation4], 1 }
 0x26b   :  { %551 = vsyncpa [#allocation4 + $0x1], 1 }
 0x26c   :  { %552 = vsyncpa [#allocation7], 1 }
 0x26d   :  { %553 = vsyncpa [#allocation5], 1 }
 0x26e   :  { %555 = vsyncpa [#allocation5 + $0x1], 1 }

</bundles_post_ra>
